<compile_context>
chip_gen: v7x
topology: tpu7x:2x2x1
jax: 0.10.0
libtpu: 0.0.40
codegen_flags: <defaults>
</compile_context>

<pallas_src>
import functools

import jax
import jax.numpy as jnp
from jax.experimental import pallas as pl
from jax.experimental.pallas import tpu as pltpu


def _layernorm2d_kernel(x_ref, w_ref, b_ref, o_ref, *, eps, inv_c):
    # x_ref: (1, C, THW) block of the (N, C, H*W) input.
    # w_ref/b_ref: (C, 1) — broadcast along the lane (pixel) axis.
    x = x_ref[...].astype(jnp.float32)                       # (1, C, T)

    # Mean over channels (sublane-axis reduce), then centered values are
    # materialized once and reused for variance and the normalized output.
    mean = jnp.sum(x, axis=1, keepdims=True) * inv_c          # (1, 1, T)
    xc = x - mean
    var = jnp.sum(xc * xc, axis=1, keepdims=True) * inv_c     # biased variance
    inv = jax.lax.rsqrt(var + eps)                            # EUP slot: ~free

    w = w_ref[...].astype(jnp.float32)                        # (C, 1) -> (1, C, T)
    b = b_ref[...].astype(jnp.float32)
    o_ref[...] = (xc * (inv * w) + b).astype(o_ref.dtype)


def _choose_tile_hw(hw, c, itemsize, vmem_block_budget=16 * 1024 * 1024):
    """Largest legal lane tile: full HW if it fits, else a multiple of 128."""
    # Double-buffered input + output blocks: 2 * 2 * C * THW * itemsize bytes.
    per_lane_bytes = 4 * c * itemsize
    max_thw = max(128, vmem_block_budget // per_lane_bytes)
    if hw <= max_thw:
        return hw                                   # full extent: always legal
    return max(128, (min(max_thw, 8192) // 128) * 128)   # lane-dense tile


def layernorm2d(x, weight, bias, *, eps=1e-6, tile_hw=None):
    """x: (N, C, H, W) NCHW, weight/bias: (C,). Returns (N, C, H, W)."""
    N, C, H, W = x.shape
    HW = H * W

    # Free reshapes only — no transpose, no extra HBM traffic.
    x3 = x.reshape(N, C, HW)
    w2 = weight.reshape(C, 1)
    b2 = bias.reshape(C, 1)

    itemsize = jnp.dtype(x.dtype).itemsize
    thw = tile_hw if tile_hw is not None else _choose_tile_hw(HW, C, itemsize)
    num_tiles = pl.cdiv(HW, thw)   # partial tail blocks are masked on store

    kernel = functools.partial(
        _layernorm2d_kernel, eps=float(eps), inv_c=1.0 / float(C))

    cost = pl.CostEstimate(
        flops=8 * N * C * HW,
        transcendentals=N * HW,
        bytes_accessed=2 * N * C * HW * itemsize
        + 2 * C * jnp.dtype(weight.dtype).itemsize,
    )

    out3 = pl.pallas_call(
        kernel,
        out_shape=jax.ShapeDtypeStruct((N, C, HW), x.dtype),
        grid_spec=pltpu.PrefetchScalarGridSpec(
            num_scalar_prefetch=0,
            grid=(N, num_tiles),
            in_specs=[
                pl.BlockSpec((1, C, thw), lambda n, t: (n, 0, t)),
                pl.BlockSpec((C, 1), lambda n, t: (0, 0)),
                pl.BlockSpec((C, 1), lambda n, t: (0, 0)),
            ],
            out_specs=pl.BlockSpec((1, C, thw), lambda n, t: (n, 0, t)),
        ),
        compiler_params=pltpu.CompilerParams(
            dimension_semantics=("parallel", "parallel"),
            vmem_limit_bytes=64 * 1024 * 1024,
        ),
        cost_estimate=cost,
    )(x3, w2, b2)

    return out3.reshape(N, C, H, W)


def _reference(x, weight, bias, eps=1e-6):
    u = jnp.mean(x, axis=1, keepdims=True)
    s = jnp.mean((x - u) ** 2, axis=1, keepdims=True)
    xn = (x - u) / jnp.sqrt(s + eps)
    return weight[None, :, None, None] * xn + bias[None, :, None, None]


if __name__ == "__main__":
    key = jax.random.PRNGKey(0)

    # Small shape matching the bundled module test (single-tile path).
    N, C, H, W = 2, 4, 16, 16
    x = jax.random.normal(key, (N, C, H, W), dtype=jnp.float32)
    weight = jnp.ones((C,), dtype=jnp.float32)   # nn.Parameter(torch.ones(C))
    bias = jnp.zeros((C,), dtype=jnp.float32)    # nn.Parameter(torch.zeros(C))

    out = layernorm2d(x, weight, bias, eps=1e-6)
    out = jax.block_until_ready(out)
    ref = _reference(x, weight, bias, eps=1e-6)
    assert out.shape == (N, C, H, W)
    assert jnp.allclose(out, ref, atol=1e-5, rtol=1e-5)

    # Second check exercising the multi-tile grid path + non-trivial affine.
    k1, k2, k3 = jax.random.split(key, 3)
    N2, C2, H2, W2 = 1, 32, 64, 64
    x2 = jax.random.normal(k1, (N2, C2, H2, W2), dtype=jnp.float32)
    w2 = jax.random.normal(k2, (C2,), dtype=jnp.float32)
    b2 = jax.random.normal(k3, (C2,), dtype=jnp.float32)
    out2 = layernorm2d(x2, w2, b2, eps=1e-6, tile_hw=1024)
    out2 = jax.block_until_ready(out2)
    ref2 = _reference(x2, w2, b2, eps=1e-6)
    assert jnp.allclose(out2, ref2, atol=1e-4, rtol=1e-4)

    print("KERNEL_OK")
</pallas_src>

<mosaic_0001>
module attributes {stable_mosaic.version = 11 : i64} {
  func.func @_layernorm2d_kernel(%arg0: i32, %arg1: i32, %arg2: memref<1x4x256xf32, #tpu.memory_space<vmem>>, %arg3: memref<4x1xf32, #tpu.memory_space<vmem>>, %arg4: memref<4x1xf32, #tpu.memory_space<vmem>>, %arg5: memref<1x4x256xf32, #tpu.memory_space<vmem>>) attributes {dimension_semantics = [#tpu.dimension_semantics<parallel>, #tpu.dimension_semantics<parallel>], iteration_bounds = array<i64: 2, 1>, scalar_prefetch = 0 : i64, scratch_operands = 0 : i64, tpu.core_type = #tpu.core_type<tc>, window_params = [{transform_indices = @transform_0, window_bounds = array<i64: 1, 4, 256>}, {pipeline_mode = #tpu.pipeline_mode<synchronous>, transform_indices = @transform_1, window_bounds = array<i64: 4, 1>}, {pipeline_mode = #tpu.pipeline_mode<synchronous>, transform_indices = @transform_2, window_bounds = array<i64: 4, 1>}, {transform_indices = @transform_3, window_bounds = array<i64: 1, 4, 256>}]} {
    %c0 = arith.constant 0 : index
    %c0_0 = arith.constant 0 : index
    %c0_1 = arith.constant 0 : index
    %0 = vector.load %arg2[%c0, %c0_0, %c0_1] : memref<1x4x256xf32, #tpu.memory_space<vmem>>, vector<1x4x256xf32>
    %cst = arith.constant dense<0.000000e+00> : vector<1x256xf32>
    %1 = vector.multi_reduction <add>, %0, %cst [1] : vector<1x4x256xf32> to vector<1x256xf32>
    %2 = vector.shape_cast %1 : vector<1x256xf32> to vector<1x1x256xf32>
    %cst_2 = arith.constant 2.500000e-01 : f32
    %3 = vector.broadcast %cst_2 : f32 to vector<1x1x256xf32>
    %4 = arith.mulf %2, %3 : vector<1x1x256xf32>
    %5 = vector.broadcast %4 : vector<1x1x256xf32> to vector<1x4x256xf32>
    %6 = arith.subf %0, %5 : vector<1x4x256xf32>
    %7 = arith.mulf %6, %6 : vector<1x4x256xf32>
    %cst_3 = arith.constant dense<0.000000e+00> : vector<1x256xf32>
    %8 = vector.multi_reduction <add>, %7, %cst_3 [1] : vector<1x4x256xf32> to vector<1x256xf32>
    %9 = vector.shape_cast %8 : vector<1x256xf32> to vector<1x1x256xf32>
    %cst_4 = arith.constant 2.500000e-01 : f32
    %10 = vector.broadcast %cst_4 : f32 to vector<1x1x256xf32>
    %11 = arith.mulf %9, %10 : vector<1x1x256xf32>
    %cst_5 = arith.constant 9.99999997E-7 : f32
    %12 = vector.broadcast %cst_5 : f32 to vector<1x1x256xf32>
    %13 = arith.addf %11, %12 : vector<1x1x256xf32>
    %14 = math.rsqrt %13 : vector<1x1x256xf32>
    %c0_6 = arith.constant 0 : index
    %c0_7 = arith.constant 0 : index
    %15 = vector.load %arg3[%c0_6, %c0_7] : memref<4x1xf32, #tpu.memory_space<vmem>>, vector<4x1xf32>
    %c0_8 = arith.constant 0 : index
    %c0_9 = arith.constant 0 : index
    %16 = vector.load %arg4[%c0_8, %c0_9] : memref<4x1xf32, #tpu.memory_space<vmem>>, vector<4x1xf32>
    %17 = vector.shape_cast %15 : vector<4x1xf32> to vector<1x4x1xf32>
    %18 = vector.broadcast %14 : vector<1x1x256xf32> to vector<1x4x256xf32>
    %19 = vector.broadcast %17 : vector<1x4x1xf32> to vector<1x4x256xf32>
    %20 = arith.mulf %18, %19 : vector<1x4x256xf32>
    %21 = arith.mulf %6, %20 : vector<1x4x256xf32>
    %22 = vector.shape_cast %16 : vector<4x1xf32> to vector<1x4x1xf32>
    %23 = vector.broadcast %22 : vector<1x4x1xf32> to vector<1x4x256xf32>
    %24 = arith.addf %21, %23 : vector<1x4x256xf32>
    %c0_10 = arith.constant 0 : index
    %c0_11 = arith.constant 0 : index
    %c0_12 = arith.constant 0 : index
    %25 = vector.load %arg5[%c0_10, %c0_11, %c0_12] : memref<1x4x256xf32, #tpu.memory_space<vmem>>, vector<1x4x256xf32>
    tpu.vector_store %arg5[%c0_10, %c0_11, %c0_12], %24 {strides = array<i32>} : memref<1x4x256xf32, #tpu.memory_space<vmem>>, vector<1x4x256xf32>,
    return
  }
  func.func @transform_0(%arg0: i32, %arg1: i32) -> (i32, i32, i32) {
    %c0_i32 = arith.constant 0 : i32
    %c0_i32_0 = arith.constant 0 : i32
    return %arg0, %c0_i32, %arg1 : i32, i32, i32
  }
  func.func @transform_1(%arg0: i32, %arg1: i32) -> (i32, i32) {
    %c0_i32 = arith.constant 0 : i32
    %c0_i32_0 = arith.constant 0 : i32
    %c0_i32_1 = arith.constant 0 : i32
    return %c0_i32, %c0_i32_0 : i32, i32
  }
  func.func @transform_2(%arg0: i32, %arg1: i32) -> (i32, i32) {
    %c0_i32 = arith.constant 0 : i32
    %c0_i32_0 = arith.constant 0 : i32
    %c0_i32_1 = arith.constant 0 : i32
    return %c0_i32, %c0_i32_0 : i32, i32
  }
  func.func @transform_3(%arg0: i32, %arg1: i32) -> (i32, i32, i32) {
    %c0_i32 = arith.constant 0 : i32
    %c0_i32_0 = arith.constant 0 : i32
    return %arg0, %c0_i32, %arg1 : i32, i32, i32
  }
}

</mosaic_0001>

<bundles_post_ra>
// kernel: tpu_custom_call.1
= control target key start
LH: loop header
LB: loop body
LE: loop exit
PB: predicated region body
PF: predicated region fallthrough
CT: control target
= control target key end

     0   :  { %8 = vsyncpa [#allocation3], 0  ;;  %s993_s0 = inlined_call_operand.hbm [shape: f32[2,4,256], index: 0, kind: input, shape index: {}]   ;;  %s994_s1 = inlined_call_operand.hbm [shape: f32[4,1], index: 1, kind: input, shape index: {}]   ;;  %s995_s2 = inlined_call_operand.hbm [shape: f32[4,1], index: 2, kind: input, shape index: {}]   ;;  %s996_s3 = inlined_call_operand.hbm [shape: f32[2,4,256], index: 3, kind: output, shape index: {}]  }
   0x1   :  { %10 = vsyncpa [#allocation3 + $0x1], 0 }
   0x2   :  { %11 = vsyncpa [#allocation6], 0 }
   0x3   :  { %12 = vsyncpa [#allocation4], 0 }
   0x4   :  { %14 = vsyncpa [#allocation4 + $0x1], 0  ;;  %s742_s12 = smov 0   ;;  %s744_s13 = smov 0  }
   0x5   :  { %s746_s14 = smov 0   ;;  %s748_s15 = smov 0  }
   0x6   :  { %s750_s16 = smov 0   ;;  %s752_s17 = smov 0  }
   0x7 LB: > { %s430_s18 = sadd.s32 4294967295, %s714_s17   ;;  %s431_s19 = sadd.s32 4294967294, %s714_s17   ;;  %s714_s17 = sphi %s752_s17, %s20_s17   ;;  %s710_s16 = sphi %s750_s16, %s1019_s16   ;;  %s706_s15 = sphi %s748_s15, %s1018_s15   ;;  %s702_s14 = sphi %s746_s14, %s1017_s14   ;;  %s698_s13 = sphi %s744_s13, %s1016_s13   ;;  %s694_s12 = sphi %s742_s12, %s1015_s12  }
   0x8   : > { %p54_p0 = scmp.ne.s32.totalorder %s698_s13, %s694_s12  ;;  %p776_p1 = scmp.eq.s32.totalorder %s430_s18, 0 }
   0x9   : > { %p780_p2 = scmp.eq.s32.totalorder %s430_s18, 1  ;;  %p128_p3 = scmp.eq.s32.totalorder %s431_s19, 1 }
   0xa   : > { %s1001_s20 = scalar_select %p776_p1, 1, 0 }
   0xb   : > { %s1002_s21 = scalar_select %p780_p2, 1, 0 }
   0xc   : > { %p786_p4 = por %p776_p1, %p54_p0  ;;  %p432_p5 = scmp.ge.s32.totalorder %s714_s17, 1 }
   0xd   : > { %p791_p6 = por %p128_p3, %p54_p0  ;;  %p135_p7 = scmp.lt.s32.totalorder %s714_s17, 3 }
   0xe   : > { %s1003_s22 = scalar_select %p786_p4, 1, 0 }
   0xf   : > { %s1004_s23 = scalar_select %p791_p6, 1, 0 }
  0x10   : > { %p796_p8 = pnand %p432_p5, %p135_p7  ;;  %s716_s25 = smov [#allocation5]  }
  0x11   : > { %s148_s26 = sshll.u32 %s716_s25, 4  ;;  %s717_s27 = smov [#allocation7]   ;;  %s149_s26 = int_to_ptr.vmem [resolvable:$true] %s148_s26 }
  0x12   : > { %s1005_s24 = scalar_select %p796_p8, 1, 0 }
  0x13   : > { %p463_p10 = pneg %p796_p8  ;;  %s159_s28 = sshll.u32 %s717_s27, 4  ;;  %s809_s28 = int_to_ptr.vmem [resolvable:$true] %s159_s28 }
  0x14   : > { %s542_s5 = scalar_lea.hbm %s994_s1, 64 }
  0x15   : > { %p805_p11 = pnand %p463_p10, %p776_p1  ;;  %p543_p12 = scmp.ne.s32.totalorder %s994_s1, %s542_s5 }
  0x16   : > { %p549_p5 = scmp.lt.u32.totalorder %s542_s5, %s994_s1 }
  0x17   : > { %p544_p13 = pneg %p805_p11 }
  0x19   : > { %p545_p0 = pnand %p544_p13, %p543_p12 }
  0x1b   : > { %p546_p3 = pneg %p545_p0 }
  0x1d   : > { %p551_p7 = pnand %p549_p5, %p546_p3 }
  0x1f   : > { %554 = shalt.err (!%p551_p7)
}
  0x20   : > { %s555_s10 = scalar_lea.vmem %s149_s26, 64  ;;  %p563_p1 = scmp.lt.s32.totalorder %s149_s26, %s149_s26 }
  0x21   : > { %p556_p10 = scmp.ne.s32.totalorder %s149_s26, %s555_s10  ;;  %p564_p4 = scmp.lt.s32.totalorder %s555_s10, %s555_s10 }
  0x23   : > { %p558_p9 = pnand %p556_p10, %p544_p13  ;;  %p565_p8 = por %p564_p4, %p563_p1 }
  0x25   : > { %p559_p6 = pneg %p558_p9 }
  0x27   : > { %p566_p2 = pnand %p565_p8, %p559_p6 }
  0x29   : > { %569 = shalt.err (!%p566_p2)
}
  0x2a   : > { %466 = dma.hbm_to_vmem [thread:$0]  (!%p805_p11), %s994_s1, 64, %s149_s26, [#allocation6]  }
  0x2b   : > { %s570_s27 = scalar_lea.hbm %s995_s2, 64 }
  0x2c   : > { %p571_p9 = scmp.ne.s32.totalorder %s995_s2, %s570_s27  ;;  %p577_p2 = scmp.lt.u32.totalorder %s570_s27, %s995_s2 }
  0x2e   : > { %p573_p1 = pnand %p571_p9, %p544_p13 }
  0x30   : > { %p574_p4 = pneg %p573_p1 }
  0x32   : > { %p579_p6 = pnand %p577_p2, %p574_p4 }
  0x34   : > { %582 = shalt.err (!%p579_p6)
}
  0x35   : > { %s583_s26 = scalar_lea.vmem %s809_s28, 64  ;;  %p591_p3 = scmp.lt.s32.totalorder %s809_s28, %s809_s28 }
  0x36   : > { %p584_p8 = scmp.ne.s32.totalorder %s809_s28, %s583_s26  ;;  %p592_p5 = scmp.lt.s32.totalorder %s583_s26, %s583_s26 }
  0x38   : > { %p586_p12 = pnand %p584_p8, %p544_p13  ;;  %p593_p7 = por %p592_p5, %p591_p3 }
  0x3a   : > { %p587_p0 = pneg %p586_p12 }
  0x3c   : > { %p594_p10 = pnand %p593_p7, %p587_p0 }
  0x3e   : > { %597 = shalt.err (!%p594_p10)
}
  0x3f   : > { %469 = dma.hbm_to_vmem [thread:$0]  (!%p805_p11), %s995_s2, 64, %s809_s28, [#allocation6]  }
  0x40   : > { %s32_s9 = sadd.s32 1, %s710_s16  ;;  %s41_s10 = sadd.s32 1, %s702_s14 }
  0x41   : > { %p34_p13 = scmp.ge.s32.totalorder %s32_s9, 2  ;;  %p48_p9 = scmp.ne.s32.totalorder %s702_s14, %s698_s13 }
  0x42   : > { %p49_p1 = scmp.eq.s32.totalorder %s714_s17, 0  ;;  %p480_p4 = scmp.lt.s32.totalorder %s714_s17, 2 }
  0x43   : > { %s1021_s9 = smov (%p34_p13, %s32_s9), 0  ;;  %p1007_p6 = scmp.ne.s32.totalorder %s1002_s21, 0 }
  0x44   : > { %p50_p2 = por %p49_p1, %p48_p9  ;;  %s36_s11 = ssub.s32 %s710_s16, %s1021_s9 }
  0x45   : > { %p868_p8 = por %p1007_p6, %p48_p9  ;;  %s170_s18 = sand.u32 1, %s702_s14  }
  0x46   : > { %p39_p12 = scmp.eq.s32.totalorder %s36_s11, 0  ;;  %s436_s28 = sshll.u32 %s170_s18, 3 }
  0x47   : > { %s449_s19 = sshll.u32 %s710_s16, 7  ;;  %s174_s21 = scalar_lea.vmem [#allocation2], %s436_s28 }
  0x48   : > { %s877_s25 = scalar_select %p39_p12, %s702_s14, %s41_s10  }
  0x49   : > { %s882_s4 = scalar_lea.hbm %s993_s0, %s449_s19  ;;  %s184_s5 = sshll.u32 %s174_s21, 4  ;;  %s890_s5 = int_to_ptr.vmem [resolvable:$true] %s184_s5 }
  0x4a   : > { %p886_p11 = pnand %p480_p4, %p50_p2  ;;  %s171_s26 = scalar_lea.sflag [#allocation3], %s170_s18 }
  0x4b   : > { %s598_s7 = scalar_lea.hbm %s882_s4, 128  ;;  %s603_s11 = scalar_lea.hbm %s993_s0, 256 }
  0x4c   : > { %p599_p0 = scmp.ne.s32.totalorder %s882_s4, %s598_s7  ;;  %p600_p3 = pneg %p886_p11 }
  0x4d   : > { %p604_p10 = scmp.lt.u32.totalorder %s882_s4, %s993_s0  ;;  %p605_p13 = scmp.lt.u32.totalorder %s603_s11, %s598_s7 }
  0x4e   : > { %p601_p5 = pnand %p600_p3, %p599_p0  ;;  %p607_p1 = scmp.lt.u32.totalorder %s598_s7, %s882_s4 }
  0x4f   : > { %p606_p9 = por %p605_p13, %p604_p10 }
  0x50   : > { %p602_p7 = pneg %p601_p5 }
  0x51   : > { %p608_p4 = por %p607_p1, %p606_p9 }
  0x53   : > { %p609_p2 = pnand %p608_p4, %p602_p7 }
  0x55   : > { %612 = shalt.err (!%p609_p2)
}
  0x56   : > { %s613_s18 = scalar_lea.vmem %s890_s5, 128  ;;  %s718_s27 = smov [#allocation2]  }
  0x57   : > { %p614_p6 = scmp.ne.s32.totalorder %s890_s5, %s613_s18  ;;  %s618_s30 = sshll.u32 %s718_s27, 4  ;;  %s619_s30 = int_to_ptr.vmem [resolvable:$false] %s618_s30 }
  0x58   : > { %s620_s21 = scalar_lea.vmem %s619_s30, 256  ;;  %p621_p5 = scmp.lt.s32.totalorder %s890_s5, %s619_s30 }
  0x59   : > { %p616_p12 = pnand %p614_p6, %p600_p3  ;;  %p622_p10 = scmp.lt.s32.totalorder %s620_s21, %s613_s18 }
  0x5b   : > { %p617_p0 = pneg %p616_p12  ;;  %p623_p13 = por %p622_p10, %p621_p5 }
  0x5d   : > { %p624_p9 = pnand %p623_p13, %p617_p0 }
  0x5f   : > { %627 = shalt.err (!%p624_p9)
}
  0x60   : > { %473 = dma.hbm_to_vmem [thread:$0]  (!%p886_p11), %s882_s4, 128, %s890_s5, %s171_s26  }
  0x61   : > { %p1010_p7 = scmp.ne.s32.totalorder %s1005_s24, 0 }
  0x62   : > { %s920_s7 = sand.u32 (!%p1010_p7), 1, %s698_s13   ;;  %p1011_p3 = scmp.ne.s32.totalorder (!%p1010_p7), %s1003_s22, 0 }
  0x63   : > { %193 = sbr.rel (%p1010_p7) target bundleno = 262 (0x106), region = 32  ;;  %s440_s8 = sshll.u32 (!%p1010_p7), %s920_s7, 3 }
  0x64   : > { %s196_s10 = scalar_lea.sflag (!%p1010_p7), [#allocation3], %s920_s7  ;;  %s199_s11 = scalar_lea.vmem (!%p1010_p7), [#allocation2], %s440_s8 }
  0x6a   : > { %681 = dma.done.wait (%p1011_p3), %s196_s10, 128  }
  0x6b   : > { %683 = vsyncadd (%p1011_p3), %s196_s10, 4294967168  ;;  %p1012_p11 = scmp.ne.s32.totalorder %s1001_s20, 0 }
  0x6d   : > { %685 = dma.done.wait (%p1012_p11), [#allocation6], 128  }
  0x6e   : > { %687 = vsyncadd (%p1012_p11), [#allocation6], 4294967168  ;;  %v719_v0 = vmov 0   ;;  %v282_v1 = vld [vmem:[#allocation5] sm:$0xf]  ;;  %v232_v3 = vld [vmem:[%s199_s11] sm:$0xff]  ;;  %v303_v45 = vlaneseq }
  0x6f   : > { %536 = vset.pattern.permute.xlu0 %v719_v0  ;;  %v283_v2 = vld [vmem:[#allocation7] sm:$0xf]  ;;  %v234_v4 = vcombine.high %v232_v3, %v232_v3  ;;  %vm236_vm0 = vcmask 1043456   ;;  %v720_v43 = vmov 839922192   ;;  %s450_s20 = sshll.u32 %s706_s15, 7 }
  0x70   : > { %286 = vperm.xlu0 %536, %v282_v1   ;;  %v237_v5 = vsel %vm236_vm0, %v232_v3, 0.0  ;;  %v301_v44 = vunpack.c.l.s4 %v720_v43  ;;  %v304_v48 = vshrl.u32 %v303_v45, 7  ;;  %s229_s22 = scalar_lea.vmem [#allocation8], %s440_s8  ;;  %s944_s6 = scalar_lea.hbm %s996_s3, %s450_s20 }
  0x71   : > { %v244_v6 = vsel %vm236_vm0, %v234_v4, 0.0  ;;  %v238_v7 = vrot.slane %v237_v5, 4  ;;  %s327_s24 = sshll.u32 %s229_s22, 4  ;;  %s311_s26 = scalar_lea.sflag [#allocation4], %s920_s7  ;;  %s946_s24 = int_to_ptr.vmem [resolvable:$true] %s327_s24 }
  0x72   : > { %v245_v8 = vrot.slane %v244_v6, 4  ;;  %v302_v47 = vunpack.c.0.s8 %v301_v44  ;;  %s628_s28 = scalar_lea.vmem %s946_s24, 128  ;;  %s721_s15 = smov [#allocation8]  }
  0x73   : > { %v239_v9 = vadd.f32 %v238_v7, %v237_v5  ;;  %p629_p1 = scmp.ne.s32.totalorder %s946_s24, %s628_s28  ;;  %s632_s19 = sshll.u32 %s721_s15, 4  ;;  %s633_s19 = int_to_ptr.vmem [resolvable:$false] %s632_s19 }
  0x74   : > { %298 = vperm.xlu0 %536, %v283_v2   ;;  %v246_v10 = vadd.f32 %v245_v8, %v244_v6  ;;  %v305_v53 = vsub.s32 %v302_v47, %v304_v48  ;;  %s634_s18 = scalar_lea.vmem %s633_s19, 256  ;;  %p635_p6 = scmp.lt.s32.totalorder %s946_s24, %s633_s19 }
  0x75   : > { %v240_v11 = vrot.slane %v239_v9, 2  ;;  %p630_p4 = pnand %p629_p1, %p868_p8  ;;  %p636_p12 = scmp.lt.s32.totalorder %s634_s18, %s628_s28 }
  0x76   : > { %v247_v12 = vrot.slane %v246_v10, 2 }
  0x77   : > { %v241_v13 = vadd.f32 %v240_v11, %v239_v9  ;;  %p631_p2 = pneg %p630_p4  ;;  %p637_p0 = por %p636_p12, %p635_p6 }
  0x78   : > { %v248_v14 = vadd.f32 %v247_v12, %v246_v10 }
  0x79   : > { %v242_v15 = vrot.slane %v241_v13, 1  ;;  %p638_p5 = pnand %p637_p0, %p631_p2 }
  0x7a   : > { %v249_v16 = vrot.slane %v248_v14, 1 }
  0x7b   : > { %v243_v17 = vadd.f32 %v242_v15, %v241_v13 }
  0x7c   : > { %v250_v18 = vadd.f32 %v249_v16, %v248_v14 }
  0x7d   : > { %v251_v19 = vmul.f32 0.25, %v243_v17 }
  0x7e   : > { %v252_v20 = vmul.f32 0.25, %v250_v18 }
  0x80   : > { %v255_v21 = vcombine.low %v251_v19, %v252_v20 }
  0x82   : > { %v257_v22 = vsub.f32 %v232_v3, %v255_v21 }
  0x84   : > { %v258_v23 = vmul.f32 %v257_v22, %v257_v22 }
  0x86   : > { %v260_v24 = vcombine.high %v258_v23, %v258_v23  ;;  %v262_v25 = vsel %vm236_vm0, %v258_v23, 0.0 }
  0x87   : > { %v263_v27 = vrot.slane %v262_v25, 4 }
  0x88   : > { %v269_v26 = vsel %vm236_vm0, %v260_v24, 0.0 }
  0x89   : > { %v270_v28 = vrot.slane %v269_v26, 4  ;;  %v264_v29 = vadd.f32 %v263_v27, %v262_v25 }
  0x8b   : > { %v271_v30 = vadd.f32 %v270_v28, %v269_v26  ;;  %v265_v31 = vrot.slane %v264_v29, 2 }
  0x8d   : > { %v272_v32 = vrot.slane %v271_v30, 2  ;;  %v266_v33 = vadd.f32 %v265_v31, %v264_v29 }
  0x8f   : > { %v273_v34 = vadd.f32 %v272_v32, %v271_v30  ;;  %v267_v35 = vrot.slane %v266_v33, 1 }
  0x91   : > { %v274_v36 = vrot.slane %v273_v34, 1  ;;  %v268_v37 = vadd.f32 %v267_v35, %v266_v33 }
  0x93   : > { %v275_v38 = vadd.f32 %v274_v36, %v273_v34  ;;  %v276_v39 = vmul.f32 0.25, %v268_v37 }
  0x95   : > { %v277_v40 = vmul.f32 0.25, %v275_v38  ;;  %v278_v41 = vadd.f32 1e-06, %v276_v39 }
  0x97   : > { %v279_v42 = vadd.f32 1e-06, %v277_v40  ;;  %538 = vrsqrt.f32 %v278_v41 }
  0x99   : > { %540 = vrsqrt.f32 %v279_v42 }
  0xa1   : > { %v539_v46 = vpop.eup %538 }
  0xa3   : > { %v541_v49 = vpop.eup %540 }
  0xef   : > { %v287_v50 = vpop.permute.xlu0 %286 }
  0xf0   : > { %v289_v51 = vmul.f32 %v539_v46, %v287_v50  ;;  %v290_v52 = vmul.f32 %v541_v49, %v287_v50 }
  0xf2   : > { %v293_v54 = vcombine.low %v289_v51, %v290_v52 }
  0xf3   : > { %v299_v55 = vpop.permute.xlu0 %298 }
  0xf4   : > { %v295_v56 = vmul.f32 %v293_v54, %v257_v22  ;;  %v306_v57 = vrot.slane %v299_v55, %v305_v53 }
  0xf6   : > { %v308_v58 = vadd.f32 %v306_v57, %v295_v56 }
  0xf8   : > { %309 = vst [vmem:[%s229_s22] sm:$0xff] %v308_v58 }
  0xf9   : > { %641 = shalt.err (!%p638_p5)
}
  0xfa   : > { %s642_s27 = scalar_lea.hbm %s944_s6, 128  ;;  %s646_s7 = scalar_lea.hbm %s996_s3, 256 }
  0xfb   : > { %p643_p10 = scmp.ne.s32.totalorder %s944_s6, %s642_s27  ;;  %p647_p7 = scmp.lt.u32.totalorder %s944_s6, %s996_s3 }
  0xfc   : > { %p648_p3 = scmp.lt.u32.totalorder %s646_s7, %s642_s27  ;;  %p650_p1 = scmp.lt.u32.totalorder %s642_s27, %s944_s6 }
  0xfd   : > { %p644_p13 = pnand %p643_p10, %p868_p8 }
  0xfe   : > { %p649_p11 = por %p648_p3, %p647_p7 }
  0xff   : > { %p645_p9 = pneg %p644_p13 }
 0x100   : > { %p651_p4 = por %p650_p1, %p649_p11 }
 0x102   : > { %p652_p2 = pnand %p651_p4, %p645_p9 }
 0x104   : > { %655 = shalt.err (!%p652_p2)
}
 0x105   : > { %461 = dma.vmem_to_hbm [thread:$0]  (%p868_p8), %s946_s24, 128, %s944_s6, %s311_s26  }
 0x106 PF: > { %s339_s11 = sand.u32 1, %s694_s12   ;;  %p1013_p6 = scmp.ne.s32.totalorder %s1004_s23, 0 }
 0x107   : > { %p1014_p12 = scmp.ge.s32.totalorder %s714_s17, 2  ;;  %s340_s20 = scalar_lea.sflag [#allocation4], %s339_s11 }
 0x109   : > { %p475_p0 = pnand %p1014_p12, %p1013_p6 }
 0x10b   : > { %689 = dma.done.wait (!%p475_p0), %s340_s20, 128  }
 0x10c   : > { %691 = vsyncadd (!%p475_p0), %s340_s20, 4294967168  ;;  %s20_s17 = sadd.s32 1, %s714_s17   ;;  %s1015_s12 = smov %s698_s13 }
 0x10d   : > { %p17_p5 = scmp.ge.s32.totalorder %s20_s17, 4   ;;  %s1016_s13 = smov %s702_s14 }
 0x10e   : > { %s1017_s14 = smov %s877_s25  ;;  %s1018_s15 = smov %s710_s16 }
 0x10f   : > { %s1019_s16 = smov %s1021_s9  ;;  %19 = sbr.rel (!%p17_p5) target bundleno = 7 (0x7), region = 85 }
 0x116   :  { %345 = vsyncpa [#allocation3], 1 }
 0x117   :  { %347 = vsyncpa [#allocation3 + $0x1], 1 }
 0x118   :  { %348 = vsyncpa [#allocation6], 1 }
 0x119   :  { %349 = vsyncpa [#allocation4], 1 }
 0x11a   :  { %351 = vsyncpa [#allocation4 + $0x1], 1 }

</bundles_post_ra>
